<compile_context>
chip_gen: v7x
topology: tpu7x:2x2x1
jax: 0.10.0
libtpu: 0.0.40
codegen_flags: <defaults>
</compile_context>

<pallas_src>
import math

import jax
import jax.numpy as jnp
from jax.experimental import pallas as pl
from jax.experimental.pallas import tpu as pltpu

_HALF_LOG_2PI = 0.5 * math.log(2.0 * math.pi)


def _vi_kernel(beta_ref, x_ref, w_ref, z_ref, mu_ref, ls_ref,
               stats_ref, logpx_acc, kl_sc):
    """Streaming beta-ELBO kernel.

    grid = (batch_tiles, d_tiles); D (last axis, "arbitrary") is the streaming
    reduction axis.  Per D-step: fused decoder matmul on the MXU (bf16 in,
    f32 accumulate) + Bernoulli log-prob partial sum into f32 VMEM scratch.
    The KL term only needs the resident (B, L) tensors, so it is computed once
    at d == 0.  Final per-sample stats are written once at the last D-step as
    a single (TILE_B, 4) block: [log_px, kl, elbo, beta_elbo].
    """
    d = pl.program_id(1)
    nd = pl.num_programs(1)

    @pl.when(d == 0)
    def _init():
        logpx_acc[...] = jnp.zeros_like(logpx_acc)
        z = z_ref[...]
        mu = mu_ref[...]
        ls = ls_ref[...]
        # pz = Normal(0, 1):  -0.5*z^2 - 0.5*log(2*pi)
        log_pz = jnp.sum(-0.5 * z * z - _HALF_LOG_2PI, axis=1, keepdims=True)
        # qz = Normal(mu, exp(log_sigma))
        t = (z - mu) * jnp.exp(-ls)
        log_qz = jnp.sum(-0.5 * t * t - ls - _HALF_LOG_2PI,
                         axis=1, keepdims=True)
        kl_sc[...] = log_qz - log_pz

    # Fused decoder: logits tile on the MXU, f32 accumulation.
    logits = jnp.dot(z_ref[...].astype(jnp.bfloat16), w_ref[...],
                     preferred_element_type=jnp.float32)
    x = x_ref[...].astype(jnp.float32)
    # Bernoulli(logits).log_prob(x) = x*logits - softplus(logits), stable form.
    sp = jnp.maximum(logits, 0.0) + jnp.log1p(jnp.exp(-jnp.abs(logits)))
    logpx_acc[...] += jnp.sum(x * logits - sp, axis=1, keepdims=True)

    @pl.when(d == nd - 1)
    def _finalize():
        log_px = logpx_acc[...]                 # (TILE_B, 1) f32
        kl = kl_sc[...]                         # (TILE_B, 1) f32
        beta = beta_ref[0]                      # SMEM scalar
        tb, ncols = stats_ref.shape
        # Build the combined stats block with broadcast + where (single store,
        # no lane-concat needed).
        col = jax.lax.broadcasted_iota(jnp.int32, (tb, ncols), 1)
        log_px_b = jnp.broadcast_to(log_px, (tb, ncols))
        kl_b = jnp.broadcast_to(kl, (tb, ncols))
        stats_ref[...] = jnp.where(
            col == 0, log_px_b,
            jnp.where(col == 1, kl_b,
                      jnp.where(col == 2, log_px_b - kl_b,
                                log_px_b - beta * kl_b)))


def variational_inference(x_flat, w_dec, z, mu, log_sigma, *, beta,
                          tile_d=256):
    """Pallas-backed VariationalInference.forward.

    Takes the encoder outputs (mu, log_sigma), the reparameterized sample z
    and the decoder weights W_dec; the decoder matmul and all log-prob /
    reduction math run inside the kernel, so (B, D) logits never touch HBM.
    Returns (loss, diagnostics) matching the PyTorch module.
    """
    B, D = x_flat.shape
    L = z.shape[1]
    assert w_dec.shape == (L, D)

    # Streamed (B, D) / (L, D) arrays go HBM->VMEM in bf16 (x is binary, so
    # exact); all sums stay in f32 inside the kernel.
    x_bf = x_flat.astype(jnp.bfloat16)
    w_bf = w_dec.astype(jnp.bfloat16)
    beta_arr = jnp.full((1,), beta, dtype=jnp.float32)

    # Tile the D (reduction) axis so Pallas can double-buffer the x / W_dec
    # DMAs behind compute.  Modest tiles keep 2 inputs x 2 buffers well inside
    # the v7x 64 MiB VMEM budget even at large B / D (bigger tiles or
    # pl.Buffered(3) are fine on v5e/v6e's 128 MiB).
    if D % tile_d != 0:
        tile_d = D                 # keep edge handling trivial for this demo
    tile_b = B                     # B is tiny here; tile B too for large B
    grid = (B // tile_b, D // tile_d)

    stats = pl.pallas_call(
        _vi_kernel,
        grid=grid,
        in_specs=[
            # beta as an SMEM scalar: one sld, no recompile when beta anneals.
            pl.BlockSpec(memory_space=pltpu.MemorySpace.SMEM),
            pl.BlockSpec((tile_b, tile_d), lambda b, d: (b, d)),   # x
            pl.BlockSpec((L, tile_d), lambda b, d: (0, d)),        # W_dec
            pl.BlockSpec((tile_b, L), lambda b, d: (b, 0)),        # z
            pl.BlockSpec((tile_b, L), lambda b, d: (b, 0)),        # mu
            pl.BlockSpec((tile_b, L), lambda b, d: (b, 0)),        # log_sigma
        ],
        # Single combined per-sample output (1 writeback instead of 4).
        out_specs=pl.BlockSpec((tile_b, 4), lambda b, d: (b, 0)),
        out_shape=jax.ShapeDtypeStruct((B, 4), jnp.float32),
        scratch_shapes=[
            pltpu.VMEM((tile_b, 1), jnp.float32),   # log_px accumulator
            pltpu.VMEM((tile_b, 1), jnp.float32),   # kl
        ],
        compiler_params=pltpu.CompilerParams(
            dimension_semantics=("parallel", "arbitrary")),
    )(beta_arr, x_bf, w_bf, z, mu, log_sigma)

    log_px = stats[:, 0]
    kl = stats[:, 1]
    elbo = stats[:, 2]
    beta_elbo = stats[:, 3]
    # Batch mean over the FULL batch, done wrapper-side so the batch grid axis
    # can stay "parallel" (a (B,)-sized reduction, negligible vs. the (B, D)
    # streaming in the kernel).
    loss = -jnp.mean(beta_elbo)
    diagnostics = {"elbo": elbo, "log_px": log_px, "kl": kl}
    return loss, diagnostics


def _reference(x_flat, w_dec, z, mu, log_sigma, beta):
    """Pure-JAX reference matching the PyTorch semantics (sanity check)."""
    logits = z @ w_dec
    sp = jnp.logaddexp(0.0, logits)
    log_px = jnp.sum(x_flat * logits - sp, axis=1)
    log_pz = jnp.sum(-0.5 * z * z - _HALF_LOG_2PI, axis=1)
    sigma = jnp.exp(log_sigma)
    log_qz = jnp.sum(-0.5 * ((z - mu) / sigma) ** 2 - log_sigma
                     - _HALF_LOG_2PI, axis=1)
    kl = log_qz - log_pz
    elbo = log_px - kl
    loss = -(log_px - beta * kl).mean()
    return loss, elbo, log_px, kl


if __name__ == "__main__":
    beta = 1.1

    key = jax.random.PRNGKey(0)
    k_x, k_enc, k_dec, k_eps = jax.random.split(key, 4)

    # Small shapes consistent with an image VAE: NCHW input.
    B, C, H, W = 2, 4, 16, 16
    D = C * H * W
    L = 32

    # Binary image data (Bernoulli observation model).
    x_img = jax.random.bernoulli(k_x, 0.5, (B, C, H, W)).astype(jnp.float32)
    x_flat = x_img.reshape(B, -1)

    # Deterministic synthetic "model": linear encoder -> (mu, log_sigma),
    # reparameterized sample z; the linear decoder (Bernoulli logits) is fused
    # into the Pallas kernel via W_dec.
    # TODO(synk): the generic `model(x)` call / torch Distribution objects of
    # the original module have no Pallas equivalent; only the decoder matmul +
    # ELBO math run in-kernel.
    W_enc = 0.05 * jax.random.normal(k_enc, (D, 2 * L), jnp.float32)
    W_dec = 0.05 * jax.random.normal(k_dec, (L, D), jnp.float32)

    h = x_flat @ W_enc
    mu, log_sigma = jnp.split(h, 2, axis=1)
    eps = jax.random.normal(k_eps, (B, L), jnp.float32)
    z = mu + jnp.exp(log_sigma) * eps

    loss, diag = variational_inference(x_flat, W_dec, z, mu, log_sigma,
                                       beta=beta)
    loss = jax.block_until_ready(loss)

    # Sanity check against a pure-JAX (f32 decoder) reference.  The kernel
    # streams x / W_dec in bf16, so the log_px-dependent quantities get a
    # slightly looser tolerance; KL is computed from f32 latents exactly.
    ref_loss, ref_elbo, ref_log_px, ref_kl = _reference(
        x_flat, W_dec, z, mu, log_sigma, beta)
    assert jnp.allclose(diag["kl"], ref_kl, rtol=1e-4, atol=1e-3)
    assert jnp.allclose(diag["log_px"], ref_log_px, rtol=5e-3, atol=1.0)
    assert jnp.allclose(diag["elbo"], ref_elbo, rtol=5e-3, atol=1.0)
    assert jnp.allclose(loss, ref_loss, rtol=5e-3, atol=1.0)

    print("KERNEL_OK")
</pallas_src>

<mosaic_0001>
module attributes {stable_mosaic.version = 11 : i64} {
  func.func @_vi_kernel(%arg0: i32, %arg1: i32, %arg2: memref<1xf32, #tpu.memory_space<smem>>, %arg3: memref<2x256xbf16, #tpu.memory_space<vmem>>, %arg4: memref<32x256xbf16, #tpu.memory_space<vmem>>, %arg5: memref<2x32xf32, #tpu.memory_space<vmem>>, %arg6: memref<2x32xf32, #tpu.memory_space<vmem>>, %arg7: memref<2x32xf32, #tpu.memory_space<vmem>>, %arg8: memref<2x4xf32, #tpu.memory_space<vmem>>, %arg9: memref<2x1xf32, #tpu.memory_space<vmem>>, %arg10: memref<2x1xf32, #tpu.memory_space<vmem>>) attributes {dimension_semantics = [#tpu.dimension_semantics<parallel>, #tpu.dimension_semantics<arbitrary>], iteration_bounds = array<i64: 1, 4>, scalar_prefetch = 0 : i64, scratch_operands = 2 : i64, tpu.core_type = #tpu.core_type<tc>, window_params = [{transform_indices = @transform_0, window_bounds = array<i64: 1>}, {transform_indices = @transform_1, window_bounds = array<i64: 2, 256>}, {transform_indices = @transform_2, window_bounds = array<i64: 32, 256>}, {transform_indices = @transform_3, window_bounds = array<i64: 2, 32>}, {transform_indices = @transform_4, window_bounds = array<i64: 2, 32>}, {transform_indices = @transform_5, window_bounds = array<i64: 2, 32>}, {transform_indices = @transform_6, window_bounds = array<i64: 2, 4>}]} {
    %c0_i32 = arith.constant 0 : i32
    %0 = arith.cmpi eq, %arg1, %c0_i32 : i32
    %1 = arith.extui %0 : i1 to i32
    %c0_i32_0 = arith.constant 0 : i32
    %2 = arith.cmpi ne, %1, %c0_i32_0 : i32
    scf.if %2 {
      %cst_14 = arith.constant 0.000000e+00 : f32
      %27 = vector.broadcast %cst_14 : f32 to vector<2x1xf32>
      %c0_15 = arith.constant 0 : index
      %c0_16 = arith.constant 0 : index
      %28 = vector.load %arg9[%c0_15, %c0_16] : memref<2x1xf32, #tpu.memory_space<vmem>>, vector<2x1xf32>
      tpu.vector_store %arg9[%c0_15, %c0_16], %27 {strides = array<i32>} : memref<2x1xf32, #tpu.memory_space<vmem>>, vector<2x1xf32>,
      %c0_17 = arith.constant 0 : index
      %c0_18 = arith.constant 0 : index
      %29 = vector.load %arg5[%c0_17, %c0_18] : memref<2x32xf32, #tpu.memory_space<vmem>>, vector<2x32xf32>
      %c0_19 = arith.constant 0 : index
      %c0_20 = arith.constant 0 : index
      %30 = vector.load %arg6[%c0_19, %c0_20] : memref<2x32xf32, #tpu.memory_space<vmem>>, vector<2x32xf32>
      %c0_21 = arith.constant 0 : index
      %c0_22 = arith.constant 0 : index
      %31 = vector.load %arg7[%c0_21, %c0_22] : memref<2x32xf32, #tpu.memory_space<vmem>>, vector<2x32xf32>
      %cst_23 = arith.constant -5.000000e-01 : f32
      %32 = vector.broadcast %cst_23 : f32 to vector<2x32xf32>
      %33 = arith.mulf %32, %29 : vector<2x32xf32>
      %34 = arith.mulf %33, %29 : vector<2x32xf32>
      %cst_24 = arith.constant 0.918938517 : f32
      %35 = vector.broadcast %cst_24 : f32 to vector<2x32xf32>
      %36 = arith.subf %34, %35 : vector<2x32xf32>
      %cst_25 = arith.constant dense<0.000000e+00> : vector<2xf32>
      %37 = vector.multi_reduction <add>, %36, %cst_25 [1] : vector<2x32xf32> to vector<2xf32>
      %38 = vector.shape_cast %37 : vector<2xf32> to vector<2x1xf32>
      %39 = arith.subf %29, %30 : vector<2x32xf32>
      %cst_26 = arith.constant 0.000000e+00 : f32
      %40 = vector.broadcast %cst_26 : f32 to vector<2x32xf32>
      %41 = arith.subf %40, %31 : vector<2x32xf32>
      %42 = math.exp %41 : vector<2x32xf32>
      %43 = arith.mulf %39, %42 : vector<2x32xf32>
      %cst_27 = arith.constant -5.000000e-01 : f32
      %44 = vector.broadcast %cst_27 : f32 to vector<2x32xf32>
      %45 = arith.mulf %44, %43 : vector<2x32xf32>
      %46 = arith.mulf %45, %43 : vector<2x32xf32>
      %47 = arith.subf %46, %31 : vector<2x32xf32>
      %cst_28 = arith.constant 0.918938517 : f32
      %48 = vector.broadcast %cst_28 : f32 to vector<2x32xf32>
      %49 = arith.subf %47, %48 : vector<2x32xf32>
      %cst_29 = arith.constant dense<0.000000e+00> : vector<2xf32>
      %50 = vector.multi_reduction <add>, %49, %cst_29 [1] : vector<2x32xf32> to vector<2xf32>
      %51 = vector.shape_cast %50 : vector<2xf32> to vector<2x1xf32>
      %52 = arith.subf %51, %38 : vector<2x1xf32>
      %c0_30 = arith.constant 0 : index
      %c0_31 = arith.constant 0 : index
      %53 = vector.load %arg10[%c0_30, %c0_31] : memref<2x1xf32, #tpu.memory_space<vmem>>, vector<2x1xf32>
      tpu.vector_store %arg10[%c0_30, %c0_31], %52 {strides = array<i32>} : memref<2x1xf32, #tpu.memory_space<vmem>>, vector<2x1xf32>,
    } else {
    }
    %c0 = arith.constant 0 : index
    %c0_1 = arith.constant 0 : index
    %3 = vector.load %arg5[%c0, %c0_1] : memref<2x32xf32, #tpu.memory_space<vmem>>, vector<2x32xf32>
    %4 = arith.truncf %3 : vector<2x32xf32> to vector<2x32xbf16>
    %c0_2 = arith.constant 0 : index
    %c0_3 = arith.constant 0 : index
    %5 = vector.load %arg4[%c0_2, %c0_3] : memref<32x256xbf16, #tpu.memory_space<vmem>>, vector<32x256xbf16>
    %cst = arith.constant dense<0.000000e+00> : vector<2x256xf32>
    %6 = tpu.matmul %4, %5, %cst {dimension_numbers = #tpu.dot_dimension_numbers<[1], [0], [0], [1], [0, 0, 1, 1], [], []>} : vector<2x32xbf16>, vector<32x256xbf16>, vector<2x256xf32> -> vector<2x256xf32>
    %c0_4 = arith.constant 0 : index
    %c0_5 = arith.constant 0 : index
    %7 = vector.load %arg3[%c0_4, %c0_5] : memref<2x256xbf16, #tpu.memory_space<vmem>>, vector<2x256xbf16>
    %8 = arith.extf %7 : vector<2x256xbf16> to vector<2x256xf32>
    %cst_6 = arith.constant 0.000000e+00 : f32
    %9 = vector.broadcast %cst_6 : f32 to vector<2x256xf32>
    %10 = arith.maximumf %6, %9 : vector<2x256xf32>
    %11 = math.absf %6 : vector<2x256xf32>
    %cst_7 = arith.constant 0.000000e+00 : f32
    %12 = vector.broadcast %cst_7 : f32 to vector<2x256xf32>
    %13 = arith.subf %12, %11 : vector<2x256xf32>
    %14 = math.exp %13 : vector<2x256xf32>
    %15 = math.log1p %14 : vector<2x256xf32>
    %16 = arith.addf %10, %15 : vector<2x256xf32>
    %c0_8 = arith.constant 0 : index
    %c0_9 = arith.constant 0 : index
    %17 = vector.load %arg9[%c0_8, %c0_9] : memref<2x1xf32, #tpu.memory_space<vmem>>, vector<2x1xf32>
    %18 = arith.mulf %8, %6 : vector<2x256xf32>
    %19 = arith.subf %18, %16 : vector<2x256xf32>
    %cst_10 = arith.constant dense<0.000000e+00> : vector<2xf32>
    %20 = vector.multi_reduction <add>, %19, %cst_10 [1] : vector<2x256xf32> to vector<2xf32>
    %21 = vector.shape_cast %20 : vector<2xf32> to vector<2x1xf32>
    %22 = arith.addf %17, %21 : vector<2x1xf32>
    %c0_11 = arith.constant 0 : index
    %c0_12 = arith.constant 0 : index
    %23 = vector.load %arg9[%c0_11, %c0_12] : memref<2x1xf32, #tpu.memory_space<vmem>>, vector<2x1xf32>
    tpu.vector_store %arg9[%c0_11, %c0_12], %22 {strides = array<i32>} : memref<2x1xf32, #tpu.memory_space<vmem>>, vector<2x1xf32>,
    %c3_i32 = arith.constant 3 : i32
    %24 = arith.cmpi eq, %arg1, %c3_i32 : i32
    %25 = arith.extui %24 : i1 to i32
    %c0_i32_13 = arith.constant 0 : i32
    %26 = arith.cmpi ne, %25, %c0_i32_13 : i32
    scf.if %26 {
      %c0_14 = arith.constant 0 : index
      %c0_15 = arith.constant 0 : index
      %27 = vector.load %arg9[%c0_14, %c0_15] : memref<2x1xf32, #tpu.memory_space<vmem>>, vector<2x1xf32>
      %c0_16 = arith.constant 0 : index
      %c0_17 = arith.constant 0 : index
      %28 = vector.load %arg10[%c0_16, %c0_17] : memref<2x1xf32, #tpu.memory_space<vmem>>, vector<2x1xf32>
      %c0_18 = arith.constant 0 : index
      %29 = memref.load %arg2[%c0_18] : memref<1xf32, #tpu.memory_space<smem>>
      %30 = tpu.iota {dimensions = array<i32: 1>} : vector<2x4xi32>
      %31 = vector.shape_cast %27 : vector<2x1xf32> to vector<2x1xf32>
      %32 = vector.broadcast %31 : vector<2x1xf32> to vector<2x4xf32>
      %33 = vector.shape_cast %28 : vector<2x1xf32> to vector<2x1xf32>
      %34 = vector.broadcast %33 : vector<2x1xf32> to vector<2x4xf32>
      %c0_i32_19 = arith.constant 0 : i32
      %35 = vector.broadcast %c0_i32_19 : i32 to vector<2x4xi32>
      %36 = arith.cmpi eq, %30, %35 : vector<2x4xi32>
      %c1_i32 = arith.constant 1 : i32
      %37 = vector.broadcast %c1_i32 : i32 to vector<2x4xi32>
      %38 = arith.cmpi eq, %30, %37 : vector<2x4xi32>
      %c2_i32 = arith.constant 2 : i32
      %39 = vector.broadcast %c2_i32 : i32 to vector<2x4xi32>
      %40 = arith.cmpi eq, %30, %39 : vector<2x4xi32>
      %41 = arith.subf %32, %34 : vector<2x4xf32>
      %42 = vector.broadcast %29 : f32 to vector<2x4xf32>
      %43 = arith.mulf %42, %34 : vector<2x4xf32>
      %44 = arith.subf %32, %43 : vector<2x4xf32>
      %45 = arith.select %40, %41, %44 : vector<2x4xi1>, vector<2x4xf32>
      %46 = arith.select %38, %34, %45 : vector<2x4xi1>, vector<2x4xf32>
      %47 = arith.select %36, %32, %46 : vector<2x4xi1>, vector<2x4xf32>
      %c0_20 = arith.constant 0 : index
      %c0_21 = arith.constant 0 : index
      %48 = vector.load %arg8[%c0_20, %c0_21] : memref<2x4xf32, #tpu.memory_space<vmem>>, vector<2x4xf32>
      tpu.vector_store %arg8[%c0_20, %c0_21], %47 {strides = array<i32>} : memref<2x4xf32, #tpu.memory_space<vmem>>, vector<2x4xf32>,
    } else {
    }
    return
  }
  func.func @transform_0(%arg0: i32, %arg1: i32) -> i32 {
    %c0_i32 = arith.constant 0 : i32
    %c0_i32_0 = arith.constant 0 : i32
    return %c0_i32 : i32
  }
  func.func @transform_1(%arg0: i32, %arg1: i32) -> (i32, i32) {
    %c0_i32 = arith.constant 0 : i32
    return %arg0, %arg1 : i32, i32
  }
  func.func @transform_2(%arg0: i32, %arg1: i32) -> (i32, i32) {
    %c0_i32 = arith.constant 0 : i32
    %c0_i32_0 = arith.constant 0 : i32
    return %c0_i32, %arg1 : i32, i32
  }
  func.func @transform_3(%arg0: i32, %arg1: i32) -> (i32, i32) {
    %c0_i32 = arith.constant 0 : i32
    %c0_i32_0 = arith.constant 0 : i32
    return %arg0, %c0_i32 : i32, i32
  }
  func.func @transform_4(%arg0: i32, %arg1: i32) -> (i32, i32) {
    %c0_i32 = arith.constant 0 : i32
    %c0_i32_0 = arith.constant 0 : i32
    return %arg0, %c0_i32 : i32, i32
  }
  func.func @transform_5(%arg0: i32, %arg1: i32) -> (i32, i32) {
    %c0_i32 = arith.constant 0 : i32
    %c0_i32_0 = arith.constant 0 : i32
    return %arg0, %c0_i32 : i32, i32
  }
  func.func @transform_6(%arg0: i32, %arg1: i32) -> (i32, i32) {
    %c0_i32 = arith.constant 0 : i32
    %c0_i32_0 = arith.constant 0 : i32
    return %arg0, %c0_i32 : i32, i32
  }
}

</mosaic_0001>

<bundles_post_ra>
// kernel: tpu_custom_call.1
= control target key start
LH: loop header
LB: loop body
LE: loop exit
PB: predicated region body
PF: predicated region fallthrough
CT: control target
= control target key end

     0   :  { %s1257_s0 = inlined_call_operand.<no memory space> [shape: f32[1], index: 0, kind: input, shape index: {}]   ;;  %s1258_s1 = inlined_call_operand.hbm [shape: bf16[2,1024], index: 1, kind: input, shape index: {}]   ;;  %s1259_s2 = inlined_call_operand.hbm [shape: bf16[32,1024], index: 2, kind: input, shape index: {}]   ;;  %s1260_s3 = inlined_call_operand.vmem [shape: f32[2,32], index: 3, kind: input, shape index: {}]   ;;  %s1261_s4 = inlined_call_operand.vmem [shape: f32[2,32], index: 4, kind: input, shape index: {}]   ;;  %s1262_s5 = inlined_call_operand.vmem [shape: f32[2,32], index: 5, kind: input, shape index: {}]   ;;  %s1263_s6 = inlined_call_operand.hbm [shape: f32[2,4], index: 6, kind: output, shape index: {}]  }
   0x1   :  { %11 = sst [smem:[#allocation4]] %s1257_s0 }
   0x2   :  { %12 = vsyncpa [#allocation6], 0 }
   0x3   :  { %14 = vsyncpa [#allocation6 + $0x1], 0 }
   0x4   :  { %15 = vsyncpa [#allocation9], 0 }
   0x5   :  { %17 = vsyncpa [#allocation9 + $0x1], 0 }
   0x6   :  { %18 = vsyncpa [#allocation7], 0  ;;  %s1037_s23 = smov 0   ;;  %s1039_s24 = smov 0  }
   0x7   :  { %s1041_s25 = smov 0   ;;  %s1043_s26 = smov 0  }
   0x8   :  { %s1045_s27 = smov 0   ;;  %s1047_s28 = smov 0  }
   0x9 LB: > { %s722_s0 = sadd.s32 4294967295, %s987_s28   ;;  %s33_s29 = sadd.s32 1, %s983_s27  ;;  %s987_s28 = sphi %s1047_s28, %s24_s28   ;;  %s983_s27 = sphi %s1045_s27, %s1275_s27   ;;  %s979_s26 = sphi %s1043_s26, %s1274_s26   ;;  %s975_s25 = sphi %s1041_s25, %s1273_s25   ;;  %s971_s24 = sphi %s1039_s24, %s1272_s24   ;;  %s967_s23 = sphi %s1037_s23, %s1271_s23  }
   0xa   : > { %p34_p0 = scmp.ge.s32.totalorder %s33_s29, 4  ;;  %s66_s30 = sadd.s32 1, %s975_s25 }
   0xb   : > { %p73_p1 = scmp.ne.s32.totalorder %s975_s25, %s971_s24  ;;  %p74_p2 = scmp.eq.s32.totalorder %s987_s28, 0 }
   0xc   : > { %s1277_s29 = smov (%p34_p0, %s33_s29), 0  ;;  %p79_p4 = scmp.ne.s32.totalorder %s971_s24, %s967_s23 }
   0xd   : > { %p1073_p3 = por %p74_p2, %p73_p1  ;;  %s62_s8 = ssub.s32 %s983_s27, %s1277_s29 }
   0xe   : > { %p80_p5 = scmp.eq.s32.totalorder %s722_s0, 0  ;;  %p64_p6 = scmp.eq.s32.totalorder %s62_s8, 0 }
   0xf   : > { %p767_p8 = scmp.lt.s32.totalorder %s987_s28, 4  ;;  %s1091_s11 = sand.u32 1, %s975_s25  }
  0x10   : > { %p1082_p7 = por %p80_p5, %p79_p4  ;;  %s750_s12 = sshll.u32 %s983_s27, 5 }
  0x11   : > { %s1088_s10 = scalar_select %p64_p6, %s975_s25, %s66_s30  }
  0x12   : > { %s1266_s9 = scalar_select %p1082_p7, 1, 0 }
  0x13   : > { %s728_s13 = sshll.u32 %s1091_s11, 1  ;;  %s1098_s16 = scalar_lea.hbm %s1258_s1, %s750_s12 }
  0x14   : > { %s261_s17 = scalar_lea.vmem [#allocation5], %s728_s13  ;;  %p1102_p9 = pnand %p767_p8, %p1073_p3 }
  0x15   : > { %s271_s18 = sshll.u32 %s261_s17, 4  ;;  %s731_s20 = sshll.u32 %s1091_s11, 5  ;;  %s1106_s18 = int_to_ptr.vmem [resolvable:$true] %s271_s18 }
  0x16   : > { %s258_s21 = scalar_lea.sflag [#allocation6], %s1091_s11  ;;  %s843_s22 = scalar_lea.hbm %s1098_s16, 32 }
  0x17   : > { %p844_p10 = scmp.ne.s32.totalorder %s1098_s16, %s843_s22  ;;  %p845_p11 = pneg %p1102_p9 }
  0x18   : > { %s848_s7 = scalar_lea.hbm %s1258_s1, 128  ;;  %p849_p0 = scmp.lt.u32.totalorder %s1098_s16, %s1258_s1 }
  0x19   : > { %p846_p12 = pnand %p845_p11, %p844_p10  ;;  %p850_p1 = scmp.lt.u32.totalorder %s848_s7, %s843_s22 }
  0x1a   : > { %p852_p3 = scmp.lt.u32.totalorder %s843_s22, %s1098_s16 }
  0x1b   : > { %p847_p13 = pneg %p846_p12  ;;  %p851_p2 = por %p850_p1, %p849_p0 }
  0x1d   : > { %p853_p4 = por %p852_p3, %p851_p2 }
  0x1f   : > { %p854_p5 = pnand %p853_p4, %p847_p13 }
  0x21   : > { %857 = shalt.err (!%p854_p5)
}
  0x22   : > { %s858_s13 = scalar_lea.vmem %s1106_s18, 32  ;;  %s989_s14 = smov [#allocation5]  }
  0x23   : > { %p859_p6 = scmp.ne.s32.totalorder %s1106_s18, %s858_s13  ;;  %s863_s15 = sshll.u32 %s989_s14, 4  ;;  %s864_s15 = int_to_ptr.vmem [resolvable:$false] %s863_s15 }
  0x24   : > { %s865_s17 = scalar_lea.vmem %s864_s15, 64  ;;  %p866_p12 = scmp.lt.s32.totalorder %s1106_s18, %s864_s15 }
  0x25   : > { %p861_p8 = pnand %p859_p6, %p845_p11  ;;  %p867_p0 = scmp.lt.s32.totalorder %s865_s17, %s858_s13 }
  0x27   : > { %p862_p10 = pneg %p861_p8  ;;  %p868_p1 = por %p867_p0, %p866_p12 }
  0x29   : > { %p869_p2 = pnand %p868_p1, %p862_p10 }
  0x2b   : > { %872 = shalt.err (!%p869_p2)
}
  0x2c   : > { %763 = dma.hbm_to_vmem [thread:$0]  (!%p1102_p9), %s1098_s16, 32, %s1106_s18, %s258_s21  }
  0x2d   : > { %s751_s22 = sshll.u32 %s983_s27, 7  ;;  %p734_p13 = scmp.ge.s32.totalorder %s987_s28, 1 }
  0x2e   : > { %p297_p3 = scmp.lt.s32.totalorder %s987_s28, 5  ;;  %s1141_s7 = scalar_lea.hbm %s1259_s2, %s751_s22 }
  0x2f   : > { %s282_s8 = scalar_lea.vmem [#allocation8], %s731_s20  ;;  %s279_s16 = scalar_lea.sflag [#allocation9], %s1091_s11 }
  0x30   : > { %s289_s12 = sshll.u32 %s282_s8, 4  ;;  %p1145_p4 = pnand %p734_p13, %p297_p3  ;;  %s1149_s12 = int_to_ptr.vmem [resolvable:$true] %s289_s12 }
  0x31   : > { %s873_s18 = scalar_lea.hbm %s1141_s7, 512  ;;  %s878_s15 = scalar_lea.hbm %s1259_s2, 2048 }
  0x32   : > { %p874_p5 = scmp.ne.s32.totalorder %s1141_s7, %s873_s18  ;;  %p879_p10 = scmp.lt.u32.totalorder %s1141_s7, %s1259_s2 }
  0x33   : > { %p880_p12 = scmp.lt.u32.totalorder %s878_s15, %s873_s18  ;;  %p882_p1 = scmp.lt.u32.totalorder %s873_s18, %s1141_s7 }
  0x34   : > { %p876_p6 = pnand %p874_p5, %p845_p11 }
  0x35   : > { %p881_p0 = por %p880_p12, %p879_p10 }
  0x36   : > { %p877_p8 = pneg %p876_p6 }
  0x37   : > { %p883_p2 = por %p882_p1, %p881_p0 }
  0x39   : > { %p884_p13 = pnand %p883_p2, %p877_p8 }
  0x3b   : > { %887 = shalt.err (!%p884_p13)
}
  0x3c   : > { %s888_s22 = scalar_lea.vmem %s1149_s12, 512  ;;  %s990_s23 = smov [#allocation8]  }
  0x3d   : > { %p889_p3 = scmp.ne.s32.totalorder %s1149_s12, %s888_s22  ;;  %s893_s30 = sshll.u32 %s990_s23, 4  ;;  %s894_s30 = int_to_ptr.vmem [resolvable:$false] %s893_s30 }
  0x3e   : > { %s895_s8 = scalar_lea.vmem %s894_s30, 1024  ;;  %p896_p7 = scmp.lt.s32.totalorder %s1149_s12, %s894_s30 }
  0x3f   : > { %p891_p5 = pnand %p889_p3, %p845_p11  ;;  %p897_p10 = scmp.lt.s32.totalorder %s895_s8, %s888_s22 }
  0x41   : > { %p892_p6 = pneg %p891_p5  ;;  %p898_p12 = por %p897_p10, %p896_p7 }
  0x43   : > { %p899_p0 = pnand %p898_p12, %p892_p6 }
  0x45   : > { %902 = shalt.err (!%p899_p0)
}
  0x46   : > { %s991_s18 = smov 512   ;;  %s992_s21 = smov 128  }
  0x47   : > { %s993_s14 = smov 8   ;;  %301 = sbr.rel (%p1145_p4) target bundleno = 837 (0x345), region = 44 }
  0x48   : > { %766 = dma.hbm_to_vmem [thread:$0]  (!%p1102_p9), %s1141_s7, 512, %s1149_s12, %s279_s16, %s991_s18, %s992_s21, %s993_s14  }
  0x49   : > { %s303_s15 = sand.u32 (!%p1145_p4), 1, %s971_s24   ;;  %p1269_p7 = scmp.ne.s32.totalorder (!%p1145_p4), %s1266_s9, 0 }
  0x4a   : > { %s735_s17 = sshll.u32 (!%p1145_p4), %s303_s15, 1  ;;  %s304_s20 = scalar_lea.sflag (!%p1145_p4), [#allocation6], %s303_s15 }
  0x4b   : > { %s1180_s22 = scalar_lea.vmem (!%p1145_p4), [#allocation5], %s735_s17 }
  0x4e   : > { %954 = dma.done.wait (%p1269_p7), %s304_s20, 32  }
  0x4f   : > { %956 = vsyncadd (%p1269_p7), %s304_s20, 4294967264  ;;  %s736_s23 = sshll.u32 %s303_s15, 5  ;;  %s313_s19 = scalar_lea.sflag [#allocation9], %s303_s15 }
  0x50   : > { %s1186_s11 = scalar_lea.vmem [#allocation8], %s736_s23 }
  0x51   : > { %958 = dma.done.wait (%p1269_p7), %s313_s19, 512  }
  0x52   : > { %960 = vsyncadd (%p1269_p7), %s313_s19, 4294966784  ;;  %p737_p9 = scmp.ne.s32.totalorder %s979_s26, 0 }
  0x53   : > { %v378_v0 = vld [vmem:[%s1260_s3] sm:$0x3] (!%p737_p9)  ;;  %vm384_vm0 = vcmask (!%p737_p9), 254976   ;;  %vm376_vm1 = vcmask (!%p737_p9), 1024   ;;  %v994_v17 = vmov (!%p737_p9), 0.0  }
  0x54   : > { %375 = sbr.rel (%p737_p9) target bundleno = 256 (0x100), region = 56  ;;  %v381_v1 = vmul.f32 (!%p737_p9), -0.5, %v378_v0  ;;  %v380_v2 = vld [vmem:[%s1262_s5] sm:$0x3] (!%p737_p9)  ;;  %377 = vst.msk [vmem:[#allocation2] sm:$0x3] (!%p737_p9), %vm376_vm1, %v994_v17 }
  0x55   : > { %v389_v3 = vsub.f32 (!%p737_p9), 0.0, %v380_v2  ;;  %v379_v8 = vld [vmem:[%s1261_s4] sm:$0x3] (!%p737_p9) }
  0x56   : > { %v382_v4 = vmul.f32 (!%p737_p9), %v381_v1, %v378_v0  ;;  %v388_v9 = vsub.f32 (!%p737_p9), %v378_v0, %v379_v8 }
  0x57   : > { %v390_v5 = vmul.f32 (!%p737_p9), 1.442695, %v389_v3 }
  0x58   : > { %v738_v6 = vadd.f32 (!%p737_p9), -0.9189385, %v382_v4 }
  0x59   : > { %826 = vpow2.f32 (!%p737_p9), %v390_v5 }
  0x5a   : > { %v385_v7 = vsel (!%p737_p9), %vm384_vm0, %v738_v6, 0.0 }
  0x5b   : > { %386 = vadd.xlane.f32.xlu0 %v385_v7 }
  0x63   : > { %v827_v10 = vpop.eup %826 }
  0x64   : > { %v392_v11 = vmul.f32 %v827_v10, %v388_v9 }
  0x66   : > { %v393_v12 = vmul.f32 -0.5, %v392_v11 }
  0x68   : > { %v394_v13 = vmul.f32 %v393_v12, %v392_v11 }
  0x6a   : > { %v395_v14 = vsub.f32 %v394_v13, %v380_v2 }
  0x6c   : > { %v739_v15 = vadd.f32 -0.9189385, %v395_v14 }
  0x6e   : > { %v397_v16 = vsel %vm384_vm0, %v739_v15, 0.0 }
  0x6f   : > { %398 = vadd.xlane.f32.xlu0 %v397_v16 }
  0xe8   : > { %v387_v18 = vpop.xlane.xlu0 %386 }
  0xfc   : > { %v399_v19 = vpop.xlane.xlu0 %398 }
  0xfd   : > { %v400_v20 = vsub.f32 %v399_v19, %v387_v18 }
  0xff   : > { %401 = vst.msk [vmem:[#allocation3] sm:$0x3] %vm376_vm1, %v400_v20 }
 0x100 PF: > { %v828_v21 = vld [vmem:[%s1186_s11 + $0x4] ss:$8 sps:$4 sm:$0xff]   ;;  %v830_v22 = vld [vmem:[%s1186_s11] ss:$8 sps:$4 sm:$0xff]   ;;  %v995_v23 = vmov 0   ;;  %vm428_vm2 = vcmask 261120   ;;  %v512_v46 = vlaneseq }
 0x101   : > { %464 = vmatprep.mubr.bf16.mxu0 %v995_v23  ;;  %432 = vmatprep.subr.bf16.mxu0 %v828_v21  ;;  %v831_v24 = vld [vmem:[%s1186_s11 + $0x14] ss:$8 sps:$4 sm:$0xff]   ;;  %v833_v25 = vld [vmem:[%s1186_s11 + $0x10] ss:$8 sps:$4 sm:$0xff]   ;;  %v996_v44 = vmov 1983009808  }
 0x102   : > { %433 = vmatpush1.bf16.msra.mxu0 %v830_v22  ;;  %v402_v26 = vld [vmem:[%s1260_s3] sm:$0x3]  ;;  %v510_v45 = vunpack.c.l.s4 %v996_v44  ;;  %v513_v50 = vshrl.u32 %v512_v46, 7  ;;  %v473_v59 = vld [vmem:[%s1180_s22] sm:$0x3]  ;;  %vm541_vm5 = vcmask 1041408  }
 0x103   : > { %434 = vmatprep.subr.bf16.mxu0 %v831_v24  ;;  %v403_v27 = vpack.c.bf16 %v402_v26, %v402_v26  ;;  %v474_v5 = vunpack.c.l.bf16 %v473_v59  ;;  %v505_v15 = vld [vmem:[#allocation2] sm:$0x3]  ;;  %vm548_vm6 = vcmask 1024   ;;  %p745_p11 = scmp.ne.s32.totalorder %s979_s26, 3 }
 0x104   : > { %v511_v49 = vunpack.c.0.s8 %v510_v45  ;;  %v997_v19 = vmov (!%p745_p11), 0   ;;  %s556_s21 = sld [smem:[#allocation4]] (!%p745_p11)  ;;  %v558_v23 = vand.u32 (!%p745_p11), 127, %v512_v46  ;;  %vm579_vm10 = vcmask (!%p745_p11), 25600  }
 0x105   : > { %842 = vset.pattern.permute.xlu0 (!%p745_p11), %v997_v19 }
 0x106   : > { %435 = vmatpush1.bf16.msra.mxu0 %v833_v25  ;;  %v514_v58 = vsub.s32 %v511_v49, %v513_v50  ;;  %v555_v18 = vld [vmem:[#allocation3] sm:$0x3] (!%p745_p11)  ;;  %vm571_vm7 = vcmp.eq.s32.totalorder (!%p745_p11), %v558_v23, 2  ;;  %vm570_vm8 = vcmp.eq.s32.totalorder (!%p745_p11), %v558_v23, 1  ;;  %vm569_vm9 = vcmp.eq.s32.totalorder (!%p745_p11), %v558_v23, 0 }
 0x109   : > { %744 = vmatmul.mubr.msk.bf16.vlgmr.msra.gmra.mrb[0].mxu0 %vm428_vm2, %v403_v27 }
 0x10a   : > { %v573_v21 = vstv (!%p745_p11), %s556_s21 }
 0x1dc   : > { %v466_v28 = vpop.f32.mrb[0].mxu0 }
 0x1dd   : > { %v477_v29 = vand.u32 2147483647, %v466_v28  ;;  %v468_v30 = vpop.f32.mrb[1].mxu0  ;;  %v475_v60 = vmax.f32 %v466_v28, 0.0 }
 0x1de   : > { %v478_v31 = vand.u32 2147483647, %v468_v30  ;;  %v508_v32 = vcombine.low %v466_v28, %v468_v30  ;;  %v470_v33 = vpop.f32.mrb[2].mxu0  ;;  %v476_v0 = vmax.f32 %v468_v30, 0.0 }
 0x1df   : > { %v479_v34 = vsub.f32 0.0, %v477_v29  ;;  %v471_v35 = vpop.f32.mrb[3].mxu0 }
 0x1e0   : > { %v480_v36 = vsub.f32 0.0, %v478_v31  ;;  %v515_v4 = vrot.slane %v508_v32, %v514_v58 }
 0x1e1   : > { %v481_v37 = vmul.f32 1.442695, %v479_v34 }
 0x1e2   : > { %v483_v38 = vmul.f32 1.442695, %v480_v36  ;;  %v517_v7 = vmul.f32 %v515_v4, %v474_v5 }
 0x1e3   : > { %834 = vpow2.f32 %v481_v37 }
 0x1e4   : > { %836 = vpow2.f32 %v483_v38 }
 0x1ed   : > { %v835_v39 = vpop.eup %834 }
 0x1ee   : > { %v837_v40 = vpop.eup %836  ;;  %v485_v41 = vadd.f32 1.0, %v835_v39  ;;  %v488_v43 = vmul.f32 -0.5, %v835_v39  ;;  %v491_v51 = vand.u32 2147483647, %v835_v39 }
 0x1ef   : > { %v494_v42 = vadd.f32 1.0, %v837_v40  ;;  %v497_v47 = vmul.f32 -0.5, %v837_v40  ;;  %v500_v53 = vand.u32 2147483647, %v837_v40 }
 0x1f0   : > { %838 = vlog2.f32 %v485_v41  ;;  %v489_v48 = vadd.f32 1.0, %v488_v43  ;;  %vm492_vm3 = vcmp.lt.f32.partialorder %v491_v51, 0.0004427343 }
 0x1f1   : > { %840 = vlog2.f32 %v494_v42  ;;  %v498_v52 = vadd.f32 1.0, %v497_v47  ;;  %vm501_vm4 = vcmp.lt.f32.partialorder %v500_v53, 0.0004427343 }
 0x1f2   : > { %v490_v57 = vmul.f32 %v835_v39, %v489_v48 }
 0x1f3   : > { %v499_v62 = vmul.f32 %v837_v40, %v498_v52 }
 0x1fa   : > { %v839_v54 = vpop.eup %838 }
 0x1fb   : > { %v841_v55 = vpop.eup %840  ;;  %v487_v56 = vmul.f32 0.6931472, %v839_v54 }
 0x1fc   : > { %v496_v61 = vmul.f32 0.6931472, %v841_v55 }
 0x1fd   : > { %v493_v63 = vsel %vm492_vm3, %v490_v57, %v487_v56 }
 0x1fe   : > { %v503_v1 = vadd.f32 %v493_v63, %v475_v60  ;;  %v502_v2 = vsel %vm501_vm4, %v499_v62, %v496_v61 }
 0x1ff   : > { %v504_v3 = vadd.f32 %v502_v2, %v476_v0 }
 0x201   : > { %v520_v6 = vcombine.low %v503_v1, %v504_v3 }
 0x203   : > { %v527_v8 = vrot.slane %v520_v6, %v514_v58 }
 0x205   : > { %v529_v9 = vsub.f32 %v517_v7, %v527_v8 }
 0x207   : > { %v537_v10 = vrot.slane %v529_v9, %v514_v58 }
 0x209   : > { %v538_v11 = vcombine.high %v537_v10, %v537_v10  ;;  %v542_v12 = vsel %vm541_vm5, %v537_v10, 0.0 }
 0x20b   : > { %v543_v13 = vsel %vm541_vm5, %v538_v11, 0.0 }
 0x20c   : > { %v544_v14 = vadd.f32 %v543_v13, %v542_v12 }
 0x20e   : > { %545 = vadd.xlane.f32.xlu0 %v544_v14 }
 0x224   : > { %566 = vperm.xlu0 (!%p745_p11), %842, %v555_v18  }
 0x298   : > { %553 = sbr.rel (%p745_p11) target bundleno = 812 (0x32c), region = 60 }
 0x29b   : > { %v546_v16 = vpop.xlane.xlu0 %545 }
 0x29c   : > { %v547_v17 = vadd.f32 %v546_v16, %v505_v15 }
 0x29e   : > { %549 = vst.msk [vmem:[#allocation2] sm:$0x3] %vm548_vm6, %v547_v17 }
 0x2a3   : > { %v567_v22 = vpop.permute.xlu0 %566 }
 0x2a4   : > { %v574_v24 = vmul.f32 %v573_v21, %v567_v22 }
 0x2a5   : > { %v554_v20 = vld [vmem:[#allocation2] sm:$0x3] }
 0x2a6   : > { %561 = vperm.xlu0 %842, %v554_v20  }
 0x325   : > { %v562_v25 = vpop.permute.xlu0 %561 }
 0x326   : > { %v572_v26 = vsub.f32 %v562_v25, %v567_v22  ;;  %v575_v27 = vsub.f32 %v562_v25, %v574_v24 }
 0x328   : > { %v576_v28 = vsel %vm571_vm7, %v572_v26, %v575_v27 }
 0x329   : > { %v577_v29 = vsel %vm570_vm8, %v567_v22, %v576_v28 }
 0x32a   : > { %v578_v30 = vsel %vm569_vm9, %v562_v25, %v577_v29 }
 0x32b   : > { %580 = vst.msk [vmem:[#allocation10] sm:$0x3] %vm579_vm10, %v578_v30 }
 0x32c PF: > { %p1213_p4 = scmp.eq.s32.totalorder %s722_s0, 3  ;;  %s998_s14 = smov [#allocation10]  }
 0x32d   : > { %s590_s15 = sshll.u32 %s998_s14, 4  ;;  %s591_s15 = int_to_ptr.vmem [resolvable:$true] %s590_s15 }
 0x32e   : > { %s903_s17 = scalar_lea.vmem %s591_s15, 32  ;;  %p910_p13 = scmp.lt.s32.totalorder %s591_s15, %s591_s15 }
 0x32f   : > { %p904_p8 = scmp.ne.s32.totalorder %s591_s15, %s903_s17  ;;  %p911_p3 = scmp.lt.s32.totalorder %s903_s17, %s903_s17 }
 0x331   : > { %p905_p1 = pnand %p904_p8, %p1213_p4  ;;  %p912_p5 = por %p911_p3, %p910_p13 }
 0x333   : > { %p906_p2 = pneg %p905_p1 }
 0x335   : > { %p913_p6 = pnand %p912_p5, %p906_p2 }
 0x337   : > { %916 = shalt.err (!%p913_p6)
}
 0x338   : > { %s917_s0 = scalar_lea.hbm %s1263_s6, 32 }
 0x339   : > { %p918_p10 = scmp.ne.s32.totalorder %s1263_s6, %s917_s0  ;;  %p923_p7 = scmp.lt.u32.totalorder %s917_s0, %s1263_s6 }
 0x33b   : > { %p919_p12 = pnand %p918_p10, %p1213_p4 }
 0x33d   : > { %p920_p0 = pneg %p919_p12 }
 0x33f   : > { %p925_p9 = pnand %p923_p7, %p920_p0 }
 0x341   : > { %928 = shalt.err (!%p925_p9)
}
 0x342   : > { %757 = dma.vmem_to_hbm [thread:$0]  (%p1213_p4), %s591_s15, 32, %s1263_s6, [#allocation7]  }
 0x343   : > { %962 = dma.done.wait (%p1213_p4), [#allocation7], 32  }
 0x344   : > { %964 = vsyncadd (%p1213_p4), [#allocation7], 4294967264 }
 0x345 PF: > { %s24_s28 = sadd.s32 1, %s987_s28   ;;  %s1271_s23 = smov %s971_s24 }
 0x346   : > { %p21_p11 = scmp.ge.s32.totalorder %s24_s28, 6   ;;  %s1272_s24 = smov %s975_s25 }
 0x347   : > { %s1273_s25 = smov %s1088_s10  ;;  %s1274_s26 = smov %s983_s27 }
 0x348   : > { %s1275_s27 = smov %s1277_s29  ;;  %23 = sbr.rel (!%p21_p11) target bundleno = 9 (0x9), region = 112 }
 0x34f   :  { %603 = vsyncpa [#allocation6], 1 }
 0x350   :  { %605 = vsyncpa [#allocation6 + $0x1], 1 }
 0x351   :  { %606 = vsyncpa [#allocation9], 1 }
 0x352   :  { %608 = vsyncpa [#allocation9 + $0x1], 1 }
 0x353   :  { %609 = vsyncpa [#allocation7], 1 }
 0x354   :  { %611 = vsyncpa [#allocation7 + $0x1], 1 }

</bundles_post_ra>
